<compile_context>
chip_gen: v5e
topology: v5e:2x2
jax: 0.10.0
libtpu: 0.0.40
codegen_flags: <defaults>
</compile_context>

<pallas_src>
import functools

import jax
import jax.numpy as jnp
from jax.experimental import pallas as pl
from jax.experimental.pallas import tpu as pltpu

EMB_DIM = 81      # emb_dim must equal 81 (Linear(81, emb_dim) + residual => emb_dim == 81)
D_PAD = 128       # lane-dense padded feature width
EDGE_DIM = 6      # mmm = 6
BN_EPS = 1e-5


# --------------------------------------------------------------------------- #
# Parameter packing (padding / stacking / bf16 cast / BN folding, done once)
# --------------------------------------------------------------------------- #
def _pad_lane(a, width=D_PAD):
    """Zero-pad the last axis to `width`."""
    pad = width - a.shape[-1]
    if pad <= 0:
        return a
    return jnp.pad(a, [(0, 0)] * (a.ndim - 1) + [(0, pad)])


def _pad2(w, width=D_PAD):
    """Zero-pad a 2-D (in, out) weight matrix to (width, width)."""
    return jnp.pad(w, ((0, width - w.shape[0]), (0, width - w.shape[1])))


def init_layer_params(key, emb_dim, edge_dim):
    """Raw per-layer params, PyTorch-module layout (weights as (in, out))."""
    ks = jax.random.split(key, 6)
    s_edge = 1.0 / jnp.sqrt(jnp.float32(edge_dim))
    s_emb = 1.0 / jnp.sqrt(jnp.float32(emb_dim))
    return {
        # GINEConv edge linear: Linear(edge_dim, 81)
        "we": jax.random.normal(ks[0], (edge_dim, emb_dim), jnp.float32) * s_edge,
        "be": jax.random.normal(ks[1], (emb_dim,), jnp.float32) * 0.01,
        # MLP Linear(81, emb_dim)
        "w1": jax.random.normal(ks[2], (emb_dim, emb_dim), jnp.float32) * s_emb,
        "b1": jax.random.normal(ks[3], (emb_dim,), jnp.float32) * 0.01,
        # inner BatchNorm1d(emb_dim, track_running_stats=False): affine init
        "g1": jnp.ones((emb_dim,), jnp.float32),
        "bt1": jnp.zeros((emb_dim,), jnp.float32),
        # MLP Linear(emb_dim, emb_dim)
        "w2": jax.random.normal(ks[4], (emb_dim, emb_dim), jnp.float32) * s_emb,
        "b2": jax.random.normal(ks[5], (emb_dim,), jnp.float32) * 0.01,
        # outer BatchNorm1d(emb_dim): affine + running stats (eval mode uses these)
        "og": jnp.ones((emb_dim,), jnp.float32),
        "ob": jnp.zeros((emb_dim,), jnp.float32),
        "run_mean": jnp.zeros((emb_dim,), jnp.float32),
        "run_var": jnp.ones((emb_dim,), jnp.float32),
        # GINEConv eps (train_eps=True, init 0)
        "eps": jnp.zeros((), jnp.float32),
    }


def pack_params(layers):
    """Stack per-layer raw params into padded, kernel-ready arrays."""
    def stack_row(name):                       # (L, 1, D_PAD) f32
        return jnp.stack([_pad_lane(p[name][None, :]) for p in layers])

    def stack_mat(name):                       # (L, D_PAD, D_PAD)
        return jnp.stack([_pad2(p[name]) for p in layers])

    # fold eval-mode outer BN:  y = (x - mean) / sqrt(var + eps) * og + ob
    og_eff, ob_eff = [], []
    for p in layers:
        scale = p["og"] / jnp.sqrt(p["run_var"] + BN_EPS)
        shift = p["ob"] - p["run_mean"] * scale
        og_eff.append(_pad_lane(scale[None, :]))
        ob_eff.append(_pad_lane(shift[None, :]))

    return {
        # edge linear (stays f32, consumed by the wrapper-side hoisted GEMM)
        "we": jnp.stack([_pad_lane(p["we"]) for p in layers]),            # (L, edge_dim, Dp)
        "be": stack_row("be"),                                            # (L, 1, Dp)
        # MLP weights: bf16 MXU path, f32 accumulation in-kernel
        "w1": stack_mat("w1").astype(jnp.bfloat16),
        "b1": stack_row("b1"),
        "g1": stack_row("g1"),
        "bt1": stack_row("bt1"),
        "w2": stack_mat("w2").astype(jnp.bfloat16),
        "b2": stack_row("b2"),
        "og": jnp.stack(og_eff),
        "ob": jnp.stack(ob_eff),
        "one_plus_eps": jnp.stack([1.0 + p["eps"] for p in layers]).astype(jnp.float32),  # (L,)
    }


def init_params(key, num_layers, emb_dim, edge_dim):
    raw = [init_layer_params(k, emb_dim, edge_dim)
           for k in jax.random.split(key, num_layers)]
    return pack_params(raw)


# --------------------------------------------------------------------------- #
# Fused kernel: all layers of GINEConv + BN + ReLU + residual in one call
# --------------------------------------------------------------------------- #
def gin_fused_kernel(src_ref, dst_ref, ope_ref,                      # SMEM: (E,) (E,) (L,)
                     x_ref, e_lin_ref,                               # VMEM graph data
                     w1_ref, b1_ref, g1_ref, bt1_ref,
                     w2_ref, b2_ref, og_ref, ob_ref,                 # VMEM stacked params
                     out_ref,                                        # VMEM out (N, Dp)
                     h_ref, agg_ref, msg_ref,                        # VMEM scratch
                     *, num_layers, num_edges, residual, jk):
    # resident node activation (exact f32 across all layers)
    h_ref[...] = x_ref[...]
    if jk == "sum":
        out_ref[...] = x_ref[...]            # h_list[0] = x

    def layer_body(layer, carry):
        # ---- GINEConv gather: msg[e] = h[src[e]]  (exact f32 dynamic row reads) ----
        def gather_body(e, c):
            s = src_ref[e]
            msg_ref[pl.ds(e, 1), :] = h_ref[pl.ds(s, 1), :]
            return c
        jax.lax.fori_loop(0, num_edges, gather_body, 0)

        # ---- message: relu(x_j + Linear(edge_attr))  (edge linear pre-hoisted) ----
        msg_ref[...] = jnp.maximum(msg_ref[...] + e_lin_ref[layer], 0.0)

        # ---- scatter-add at dst (segment sum via dynamic row accumulates) ----
        agg_ref[...] = jnp.zeros_like(agg_ref)

        def scatter_body(e, c):
            d = dst_ref[e]
            agg_ref[pl.ds(d, 1), :] = (agg_ref[pl.ds(d, 1), :]
                                       + msg_ref[pl.ds(e, 1), :])
            return c
        jax.lax.fori_loop(0, num_edges, scatter_body, 0)

        h = h_ref[...]                                           # this layer's input
        z = agg_ref[...] + ope_ref[layer] * h                    # (1 + eps) * x_r + aggr

        # ---- MLP: Linear -> BatchNorm1d(batch stats, two-pass) -> ReLU -> Linear -> ReLU
        t = jnp.dot(z.astype(jnp.bfloat16), w1_ref[layer],
                    preferred_element_type=jnp.float32) + b1_ref[layer]
        mean = jnp.mean(t, axis=0, keepdims=True)
        cen = t - mean
        var = jnp.mean(cen * cen, axis=0, keepdims=True)         # two-pass variance
        t = cen * jax.lax.rsqrt(var + BN_EPS) * g1_ref[layer] + bt1_ref[layer]
        t = jnp.maximum(t, 0.0)
        t = jnp.dot(t.astype(jnp.bfloat16), w2_ref[layer],
                    preferred_element_type=jnp.float32) + b2_ref[layer]
        t = jnp.maximum(t, 0.0)

        # ---- outer BatchNorm1d (eval: running stats pre-folded into scale/shift) ----
        t = t * og_ref[layer] + ob_ref[layer]

        # ReLU before dropout on all but the last layer (scalar select + max)
        relu_lb = jnp.where(layer < num_layers - 1, 0.0, -jnp.inf)
        t = jnp.maximum(t, relu_lb)
        # TODO(synk): F.dropout(p=0.7) omitted — module evaluated with training=False (identity).

        if residual:
            t = t + h                       # h_list[layer] is exactly this layer's input
        h_ref[...] = t
        if jk == "sum":
            out_ref[...] = out_ref[...] + t
        return carry

    jax.lax.fori_loop(0, num_layers, layer_body, 0)

    if jk == "last":
        out_ref[...] = h_ref[...]            # lane-dense (N, 128) store


# --------------------------------------------------------------------------- #
# Wrapper
# --------------------------------------------------------------------------- #
def gin_node_embedding_forward(x, edge_index, edge_attr, packed,
                               num_layers, JK="last", residual=True):
    """Mirrors GINNodeEmbedding.forward (eval mode). x: int node features [N, 81]."""
    N = x.shape[0]
    E = edge_index.shape[1]
    src = edge_index[0].astype(jnp.int32)
    dst = edge_index[1].astype(jnp.int32)
    x_pad = _pad_lane(x.astype(jnp.float32))                       # (N, 128), pad lanes = 0

    # Hoisted edge linear: e_lin[l] = edge_attr @ we[l] + be[l]   -> (L, E, 128)
    # (explicit HIGHEST precision; tiny K=6 GEMM done once in XLA, not per layer on the MXU)
    e_lin = jnp.einsum("ef,lfd->led",
                       edge_attr.astype(jnp.float32), packed["we"],
                       precision=jax.lax.Precision.HIGHEST) + packed["be"]

    kernel = functools.partial(gin_fused_kernel,
                               num_layers=num_layers, num_edges=E,
                               residual=residual, jk=JK)
    vmem = pl.BlockSpec(memory_space=pltpu.MemorySpace.VMEM)
    smem = pl.BlockSpec(memory_space=pltpu.MemorySpace.SMEM)

    args = (src, dst, packed["one_plus_eps"],
            x_pad, e_lin,
            packed["w1"], packed["b1"], packed["g1"], packed["bt1"],
            packed["w2"], packed["b2"], packed["og"], packed["ob"])
    in_specs = [smem, smem, smem] + [vmem] * (len(args) - 3)

    # Scoped-VMEM budget from the actual resident footprint (capped v7x-safe).
    vmem_in_bytes = sum(int(a.size) * a.dtype.itemsize for a in args[3:])
    scratch_bytes = (2 * N + E) * D_PAD * 4
    out_bytes = N * D_PAD * 4
    vmem_limit = int(min(max(2 * (vmem_in_bytes + scratch_bytes + out_bytes) + (8 << 20),
                             32 << 20),
                         64 << 20))

    out = pl.pallas_call(
        kernel,
        out_shape=jax.ShapeDtypeStruct((N, D_PAD), jnp.float32),
        in_specs=in_specs,
        out_specs=vmem,
        scratch_shapes=[pltpu.VMEM((N, D_PAD), jnp.float32),   # h (resident activation)
                        pltpu.VMEM((N, D_PAD), jnp.float32),   # agg (scatter accumulator)
                        pltpu.VMEM((E, D_PAD), jnp.float32)],  # msg (per-edge messages)
        compiler_params=pltpu.CompilerParams(vmem_limit_bytes=vmem_limit),
    )(*args)
    return out[:, :EMB_DIM]                                        # exact (pad lanes stay zero)


if __name__ == "__main__":
    key = jax.random.PRNGKey(0)
    num_layers = 2
    N, E = 32, 64
    k1, k2, k3, kp = jax.random.split(key, 4)

    x = jax.random.randint(k1, (N, EMB_DIM), 0, 5, dtype=jnp.int32)        # integer node features
    edge_index = jax.random.randint(k2, (2, E), 0, N, dtype=jnp.int32)     # [src; dst]
    edge_attr = jax.random.normal(k3, (E, EDGE_DIM), dtype=jnp.float32)
    params = init_params(kp, num_layers, EMB_DIM, EDGE_DIM)

    out = gin_node_embedding_forward(x, edge_index, edge_attr, params,
                                     num_layers, JK="last", residual=True)
    jax.block_until_ready(out)
    assert out.shape == (N, EMB_DIM) and out.dtype == jnp.float32
    print("KERNEL_OK")
</pallas_src>

<mosaic_0001>
module attributes {stable_mosaic.version = 11 : i64} {
  func.func @gin_fused_kernel(%arg0: memref<64xi32, #tpu.memory_space<smem>>, %arg1: memref<64xi32, #tpu.memory_space<smem>>, %arg2: memref<2xf32, #tpu.memory_space<smem>>, %arg3: memref<32x128xf32, #tpu.memory_space<vmem>>, %arg4: memref<2x64x128xf32, #tpu.memory_space<vmem>>, %arg5: memref<2x128x128xbf16, #tpu.memory_space<vmem>>, %arg6: memref<2x1x128xf32, #tpu.memory_space<vmem>>, %arg7: memref<2x1x128xf32, #tpu.memory_space<vmem>>, %arg8: memref<2x1x128xf32, #tpu.memory_space<vmem>>, %arg9: memref<2x128x128xbf16, #tpu.memory_space<vmem>>, %arg10: memref<2x1x128xf32, #tpu.memory_space<vmem>>, %arg11: memref<2x1x128xf32, #tpu.memory_space<vmem>>, %arg12: memref<2x1x128xf32, #tpu.memory_space<vmem>>, %arg13: memref<32x128xf32, #tpu.memory_space<vmem>>, %arg14: memref<32x128xf32, #tpu.memory_space<vmem>>, %arg15: memref<32x128xf32, #tpu.memory_space<vmem>>, %arg16: memref<64x128xf32, #tpu.memory_space<vmem>>) attributes {dimension_semantics = [], scalar_prefetch = 0 : i64, scratch_operands = 3 : i64, tpu.core_type = #tpu.core_type<tc>} {
    %c0 = arith.constant 0 : index
    %c0_0 = arith.constant 0 : index
    %0 = vector.load %arg3[%c0, %c0_0] : memref<32x128xf32, #tpu.memory_space<vmem>>, vector<32x128xf32>
    %c0_1 = arith.constant 0 : index
    %c0_2 = arith.constant 0 : index
    %1 = vector.load %arg14[%c0_1, %c0_2] : memref<32x128xf32, #tpu.memory_space<vmem>>, vector<32x128xf32>
    tpu.vector_store %arg14[%c0_1, %c0_2], %0 {strides = array<i32>} : memref<32x128xf32, #tpu.memory_space<vmem>>, vector<32x128xf32>,
    %c0_i32 = arith.constant 0 : i32
    %c2_i32 = arith.constant 2 : i32
    %2 = arith.addi %c0_i32, %c2_i32 : i32
    %c1_i32 = arith.constant 1 : i32
    scf.for %arg17 = %c0_i32 to %2 step %c1_i32  : i32 {
      %c0_i32_8 = arith.constant 0 : i32
      %c64_i32 = arith.constant 64 : i32
      %5 = arith.addi %c0_i32_8, %c64_i32 : i32
      %c1_i32_9 = arith.constant 1 : i32
      scf.for %arg18 = %c0_i32_8 to %5 step %c1_i32_9  : i32 {
        %90 = arith.index_cast %arg18 : i32 to index
        %91 = memref.load %arg0[%90] : memref<64xi32, #tpu.memory_space<smem>>
        %92 = arith.index_cast %91 : i32 to index
        %c0_58 = arith.constant 0 : index
        %93 = vector.load %arg14[%92, %c0_58] : memref<32x128xf32, #tpu.memory_space<vmem>>, vector<1x128xf32>
        %94 = arith.index_cast %arg18 : i32 to index
        %c0_59 = arith.constant 0 : index
        %95 = vector.load %arg16[%94, %c0_59] : memref<64x128xf32, #tpu.memory_space<vmem>>, vector<1x128xf32>
        tpu.vector_store %arg16[%94, %c0_59], %93 {strides = array<i32>} : memref<64x128xf32, #tpu.memory_space<vmem>>, vector<1x128xf32>,
      }
      %c64_i32_10 = arith.constant 64 : i32
      %c0_11 = arith.constant 0 : index
      %c0_12 = arith.constant 0 : index
      %6 = vector.load %arg16[%c0_11, %c0_12] : memref<64x128xf32, #tpu.memory_space<vmem>>, vector<64x128xf32>
      %7 = arith.index_cast %arg17 : i32 to index
      %c0_13 = arith.constant 0 : index
      %c0_14 = arith.constant 0 : index
      %8 = vector.load %arg4[%7, %c0_13, %c0_14] : memref<2x64x128xf32, #tpu.memory_space<vmem>>, vector<1x64x128xf32>
      %9 = vector.shape_cast %8 : vector<1x64x128xf32> to vector<64x128xf32>
      %10 = arith.addf %6, %9 : vector<64x128xf32>
      %cst = arith.constant 0.000000e+00 : f32
      %11 = vector.broadcast %cst : f32 to vector<64x128xf32>
      %12 = arith.maximumf %10, %11 : vector<64x128xf32>
      %c0_15 = arith.constant 0 : index
      %c0_16 = arith.constant 0 : index
      %13 = vector.load %arg16[%c0_15, %c0_16] : memref<64x128xf32, #tpu.memory_space<vmem>>, vector<64x128xf32>
      tpu.vector_store %arg16[%c0_15, %c0_16], %12 {strides = array<i32>} : memref<64x128xf32, #tpu.memory_space<vmem>>, vector<64x128xf32>,
      %cst_17 = arith.constant 0.000000e+00 : f32
      %14 = vector.broadcast %cst_17 : f32 to vector<32x128xf32>
      %c0_18 = arith.constant 0 : index
      %c0_19 = arith.constant 0 : index
      %15 = vector.load %arg15[%c0_18, %c0_19] : memref<32x128xf32, #tpu.memory_space<vmem>>, vector<32x128xf32>
      tpu.vector_store %arg15[%c0_18, %c0_19], %14 {strides = array<i32>} : memref<32x128xf32, #tpu.memory_space<vmem>>, vector<32x128xf32>,
      %c0_i32_20 = arith.constant 0 : i32
      %c64_i32_21 = arith.constant 64 : i32
      %16 = arith.addi %c0_i32_20, %c64_i32_21 : i32
      %c1_i32_22 = arith.constant 1 : i32
      scf.for %arg18 = %c0_i32_20 to %16 step %c1_i32_22  : i32 {
        %90 = arith.index_cast %arg18 : i32 to index
        %91 = memref.load %arg1[%90] : memref<64xi32, #tpu.memory_space<smem>>
        %92 = arith.index_cast %91 : i32 to index
        %c0_58 = arith.constant 0 : index
        %93 = vector.load %arg15[%92, %c0_58] : memref<32x128xf32, #tpu.memory_space<vmem>>, vector<1x128xf32>
        %94 = arith.index_cast %arg18 : i32 to index
        %c0_59 = arith.constant 0 : index
        %95 = vector.load %arg16[%94, %c0_59] : memref<64x128xf32, #tpu.memory_space<vmem>>, vector<1x128xf32>
        %96 = arith.addf %93, %95 : vector<1x128xf32>
        %97 = arith.index_cast %91 : i32 to index
        %c0_60 = arith.constant 0 : index
        %98 = vector.load %arg15[%97, %c0_60] : memref<32x128xf32, #tpu.memory_space<vmem>>, vector<1x128xf32>
        tpu.vector_store %arg15[%97, %c0_60], %96 {strides = array<i32>} : memref<32x128xf32, #tpu.memory_space<vmem>>, vector<1x128xf32>,
      }
      %c64_i32_23 = arith.constant 64 : i32
      %c0_24 = arith.constant 0 : index
      %c0_25 = arith.constant 0 : index
      %17 = vector.load %arg14[%c0_24, %c0_25] : memref<32x128xf32, #tpu.memory_space<vmem>>, vector<32x128xf32>
      %c0_26 = arith.constant 0 : index
      %c0_27 = arith.constant 0 : index
      %18 = vector.load %arg15[%c0_26, %c0_27] : memref<32x128xf32, #tpu.memory_space<vmem>>, vector<32x128xf32>
      %19 = arith.index_cast %arg17 : i32 to index
      %20 = memref.load %arg2[%19] : memref<2xf32, #tpu.memory_space<smem>>
      %21 = vector.broadcast %20 : f32 to vector<32x128xf32>
      %22 = arith.mulf %21, %17 : vector<32x128xf32>
      %23 = arith.addf %18, %22 : vector<32x128xf32>
      %24 = arith.truncf %23 : vector<32x128xf32> to vector<32x128xbf16>
      %25 = arith.index_cast %arg17 : i32 to index
      %c0_28 = arith.constant 0 : index
      %c0_29 = arith.constant 0 : index
      %26 = vector.load %arg5[%25, %c0_28, %c0_29] : memref<2x128x128xbf16, #tpu.memory_space<vmem>>, vector<1x128x128xbf16>
      %27 = vector.shape_cast %26 : vector<1x128x128xbf16> to vector<128x128xbf16>
      %cst_30 = arith.constant dense<0.000000e+00> : vector<32x128xf32>
      %28 = tpu.matmul %24, %27, %cst_30 {dimension_numbers = #tpu.dot_dimension_numbers<[1], [0], [0], [1], [0, 0, 1, 1], [], []>} : vector<32x128xbf16>, vector<128x128xbf16>, vector<32x128xf32> -> vector<32x128xf32>
      %29 = arith.index_cast %arg17 : i32 to index
      %c0_31 = arith.constant 0 : index
      %c0_32 = arith.constant 0 : index
      %30 = vector.load %arg6[%29, %c0_31, %c0_32] : memref<2x1x128xf32, #tpu.memory_space<vmem>>, vector<1x1x128xf32>
      %31 = vector.shape_cast %30 : vector<1x1x128xf32> to vector<1x128xf32>
      %32 = vector.broadcast %31 : vector<1x128xf32> to vector<32x128xf32>
      %33 = arith.addf %28, %32 : vector<32x128xf32>
      %cst_33 = arith.constant dense<0.000000e+00> : vector<128xf32>
      %34 = vector.multi_reduction <add>, %33, %cst_33 [0] : vector<32x128xf32> to vector<128xf32>
      %35 = vector.shape_cast %34 : vector<128xf32> to vector<1x128xf32>
      %cst_34 = arith.constant 3.200000e+01 : f32
      %36 = vector.broadcast %cst_34 : f32 to vector<1x128xf32>
      %37 = arith.divf %35, %36 : vector<1x128xf32>
      %38 = vector.broadcast %37 : vector<1x128xf32> to vector<32x128xf32>
      %39 = arith.subf %33, %38 : vector<32x128xf32>
      %40 = arith.mulf %39, %39 : vector<32x128xf32>
      %cst_35 = arith.constant dense<0.000000e+00> : vector<128xf32>
      %41 = vector.multi_reduction <add>, %40, %cst_35 [0] : vector<32x128xf32> to vector<128xf32>
      %42 = vector.shape_cast %41 : vector<128xf32> to vector<1x128xf32>
      %cst_36 = arith.constant 3.200000e+01 : f32
      %43 = vector.broadcast %cst_36 : f32 to vector<1x128xf32>
      %44 = arith.divf %42, %43 : vector<1x128xf32>
      %cst_37 = arith.constant 9.99999974E-6 : f32
      %45 = vector.broadcast %cst_37 : f32 to vector<1x128xf32>
      %46 = arith.addf %44, %45 : vector<1x128xf32>
      %47 = math.rsqrt %46 : vector<1x128xf32>
      %48 = vector.broadcast %47 : vector<1x128xf32> to vector<32x128xf32>
      %49 = arith.mulf %39, %48 : vector<32x128xf32>
      %50 = arith.index_cast %arg17 : i32 to index
      %c0_38 = arith.constant 0 : index
      %c0_39 = arith.constant 0 : index
      %51 = vector.load %arg7[%50, %c0_38, %c0_39] : memref<2x1x128xf32, #tpu.memory_space<vmem>>, vector<1x1x128xf32>
      %52 = vector.shape_cast %51 : vector<1x1x128xf32> to vector<1x128xf32>
      %53 = vector.broadcast %52 : vector<1x128xf32> to vector<32x128xf32>
      %54 = arith.mulf %49, %53 : vector<32x128xf32>
      %55 = arith.index_cast %arg17 : i32 to index
      %c0_40 = arith.constant 0 : index
      %c0_41 = arith.constant 0 : index
      %56 = vector.load %arg8[%55, %c0_40, %c0_41] : memref<2x1x128xf32, #tpu.memory_space<vmem>>, vector<1x1x128xf32>
      %57 = vector.shape_cast %56 : vector<1x1x128xf32> to vector<1x128xf32>
      %58 = vector.broadcast %57 : vector<1x128xf32> to vector<32x128xf32>
      %59 = arith.addf %54, %58 : vector<32x128xf32>
      %cst_42 = arith.constant 0.000000e+00 : f32
      %60 = vector.broadcast %cst_42 : f32 to vector<32x128xf32>
      %61 = arith.maximumf %59, %60 : vector<32x128xf32>
      %62 = arith.truncf %61 : vector<32x128xf32> to vector<32x128xbf16>
      %63 = arith.index_cast %arg17 : i32 to index
      %c0_43 = arith.constant 0 : index
      %c0_44 = arith.constant 0 : index
      %64 = vector.load %arg9[%63, %c0_43, %c0_44] : memref<2x128x128xbf16, #tpu.memory_space<vmem>>, vector<1x128x128xbf16>
      %65 = vector.shape_cast %64 : vector<1x128x128xbf16> to vector<128x128xbf16>
      %cst_45 = arith.constant dense<0.000000e+00> : vector<32x128xf32>
      %66 = tpu.matmul %62, %65, %cst_45 {dimension_numbers = #tpu.dot_dimension_numbers<[1], [0], [0], [1], [0, 0, 1, 1], [], []>} : vector<32x128xbf16>, vector<128x128xbf16>, vector<32x128xf32> -> vector<32x128xf32>
      %67 = arith.index_cast %arg17 : i32 to index
      %c0_46 = arith.constant 0 : index
      %c0_47 = arith.constant 0 : index
      %68 = vector.load %arg10[%67, %c0_46, %c0_47] : memref<2x1x128xf32, #tpu.memory_space<vmem>>, vector<1x1x128xf32>
      %69 = vector.shape_cast %68 : vector<1x1x128xf32> to vector<1x128xf32>
      %70 = vector.broadcast %69 : vector<1x128xf32> to vector<32x128xf32>
      %71 = arith.addf %66, %70 : vector<32x128xf32>
      %cst_48 = arith.constant 0.000000e+00 : f32
      %72 = vector.broadcast %cst_48 : f32 to vector<32x128xf32>
      %73 = arith.maximumf %71, %72 : vector<32x128xf32>
      %74 = arith.index_cast %arg17 : i32 to index
      %c0_49 = arith.constant 0 : index
      %c0_50 = arith.constant 0 : index
      %75 = vector.load %arg11[%74, %c0_49, %c0_50] : memref<2x1x128xf32, #tpu.memory_space<vmem>>, vector<1x1x128xf32>
      %76 = vector.shape_cast %75 : vector<1x1x128xf32> to vector<1x128xf32>
      %77 = vector.broadcast %76 : vector<1x128xf32> to vector<32x128xf32>
      %78 = arith.mulf %73, %77 : vector<32x128xf32>
      %79 = arith.index_cast %arg17 : i32 to index
      %c0_51 = arith.constant 0 : index
      %c0_52 = arith.constant 0 : index
      %80 = vector.load %arg12[%79, %c0_51, %c0_52] : memref<2x1x128xf32, #tpu.memory_space<vmem>>, vector<1x1x128xf32>
      %81 = vector.shape_cast %80 : vector<1x1x128xf32> to vector<1x128xf32>
      %82 = vector.broadcast %81 : vector<1x128xf32> to vector<32x128xf32>
      %83 = arith.addf %78, %82 : vector<32x128xf32>
      %c1_i32_53 = arith.constant 1 : i32
      %84 = arith.cmpi slt, %arg17, %c1_i32_53 : i32
      %cst_54 = arith.constant 0.000000e+00 : f32
      %cst_55 = arith.constant 0xFF800000 : f32
      %85 = arith.select %84, %cst_54, %cst_55 : f32
      %86 = vector.broadcast %85 : f32 to vector<32x128xf32>
      %87 = arith.maximumf %83, %86 : vector<32x128xf32>
      %88 = arith.addf %87, %17 : vector<32x128xf32>
      %c0_56 = arith.constant 0 : index
      %c0_57 = arith.constant 0 : index
      %89 = vector.load %arg14[%c0_56, %c0_57] : memref<32x128xf32, #tpu.memory_space<vmem>>, vector<32x128xf32>
      tpu.vector_store %arg14[%c0_56, %c0_57], %88 {strides = array<i32>} : memref<32x128xf32, #tpu.memory_space<vmem>>, vector<32x128xf32>,
    }
    %c2_i32_3 = arith.constant 2 : i32
    %c0_4 = arith.constant 0 : index
    %c0_5 = arith.constant 0 : index
    %3 = vector.load %arg14[%c0_4, %c0_5] : memref<32x128xf32, #tpu.memory_space<vmem>>, vector<32x128xf32>
    %c0_6 = arith.constant 0 : index
    %c0_7 = arith.constant 0 : index
    %4 = vector.load %arg13[%c0_6, %c0_7] : memref<32x128xf32, #tpu.memory_space<vmem>>, vector<32x128xf32>
    tpu.vector_store %arg13[%c0_6, %c0_7], %3 {strides = array<i32>} : memref<32x128xf32, #tpu.memory_space<vmem>>, vector<32x128xf32>,
    return
  }
}

</mosaic_0001>

<bundles_post_ra>
// kernel: tpu_custom_call.1
= control target key start
LH: loop header
LB: loop body
LE: loop exit
PB: predicated region body
PF: predicated region fallthrough
CT: control target
= control target key end

     0   :  { %18 = vsyncpa [#allocation8], 0  ;;  %s1202_s0 = inlined_call_operand.hbm [shape: s32[64], index: 0, kind: input, shape index: {}]   ;;  %s1203_s1 = inlined_call_operand.hbm [shape: s32[64], index: 1, kind: input, shape index: {}]   ;;  %s1204_s2 = inlined_call_operand.hbm [shape: f32[2], index: 2, kind: input, shape index: {}]   ;;  %s1205_s3 = inlined_call_operand.hbm [shape: f32[32,128], index: 3, kind: input, shape index: {}]   ;;  %s1206_s4 = inlined_call_operand.hbm [shape: f32[2,64,128], index: 4, kind: input, shape index: {}]   ;;  %s1207_s5 = inlined_call_operand.hbm [shape: bf16[2,128,128], index: 5, kind: input, shape index: {}]   ;;  %s1208_s6 = inlined_call_operand.vmem [shape: f32[2,1,128], index: 6, kind: input, shape index: {}]   ;;  %s1209_s7 = inlined_call_operand.vmem [shape: f32[2,1,128], index: 7, kind: input, shape index: {}]   ;;  %s1210_s8 = inlined_call_operand.vmem [shape: f32[2,1,128], index: 8, kind: input, shape index: {}]   ;;  %s1211_s9 = inlined_call_operand.hbm [shape: bf16[2,128,128], index: 9, kind: input, shape index: {}]   ;;  %s1212_s10 = inlined_call_operand.vmem [shape: f32[2,1,128], index: 10, kind: input, shape index: {}]   ;;  %s1213_s11 = inlined_call_operand.vmem [shape: f32[2,1,128], index: 11, kind: input, shape index: {}]   ;;  %s1214_s12 = inlined_call_operand.hbm [shape: f32[2,1,128], index: 12, kind: input, shape index: {}]   ;;  %s1215_s13 = inlined_call_operand.hbm [shape: f32[32,128], index: 13, kind: output, shape index: {}]  }
   0x1   :  { %19 = vsyncpa [#allocation10], 0 }
   0x2   :  { %20 = vsyncpa [#allocation6], 0 }
   0x3   :  { %21 = vsyncpa [#allocation14], 0 }
   0x4   :  { %22 = vsyncpa [#allocation17], 0  ;;  %s38_s27 = sshll.u32 %s1203_s1, 4  ;;  %s39_s27 = int_to_ptr.hbm [resolvable:$true] %s38_s27 }
   0x5   :  { %23 = vsyncpa [#allocation7], 0  ;;  %s986_s28 = smov [#allocation9]   ;;  %s68_s14 = sshll.u32 %s1206_s4, 4  ;;  %s69_s14 = int_to_ptr.hbm [resolvable:$true] %s68_s14 }
   0x6   :  { %41 = dma.hbm_to_smem %s39_s27, 16, %s986_s28, [#allocation10]  }
   0x7   :  { %s987_s15 = smov [#allocation13]   ;;  %s988_s17 = smov 128  }
   0x8   :  { %s70_s16 = sshll.u32 %s987_s15, 4  ;;  %s989_s18 = smov 8   ;;  %s71_s16 = int_to_ptr.vmem [resolvable:$true] %s70_s16 }
   0x9   :  { %76 = dma.hbm_to_vmem [thread:$0]  %s69_s14, 2048, %s71_s16, [#allocation14], %s988_s17, %s988_s17, %s989_s18  }
   0xa   :  { %s100_s20 = sshll.u32 %s1211_s9, 4  ;;  %s990_s21 = smov [#allocation16]   ;;  %s101_s20 = int_to_ptr.hbm [resolvable:$true] %s100_s20 }
   0xb   :  { %s102_s22 = sshll.u32 %s990_s21, 4  ;;  %s29_s24 = sshll.u32 %s1202_s0, 4  ;;  %s103_s22 = int_to_ptr.vmem [resolvable:$true] %s102_s22  ;;  %s30_s24 = int_to_ptr.hbm [resolvable:$true] %s29_s24 }
   0xc   :  { %s991_s25 = smov 64   ;;  %s992_s26 = smov 4  }
   0xd   :  { %108 = dma.hbm_to_vmem [thread:$0]  %s101_s20, 2048, %s103_s22, [#allocation17], %s991_s25, %s991_s25, %s992_s26  }
   0xe   :  { %s993_s27 = smov [#allocation5]   ;;  %s47_s30 = sshll.u32 %s1204_s2, 4  ;;  %s48_s30 = int_to_ptr.hbm [resolvable:$true] %s47_s30 }
   0xf   :  { %32 = dma.hbm_to_smem %s30_s24, 16, %s993_s27, [#allocation8]  }
  0x10   :  { %s55_s15 = sshll.u32 %s1205_s3, 4  ;;  %s994_s16 = smov [#allocation11]   ;;  %s56_s15 = int_to_ptr.hbm [resolvable:$true] %s55_s15 }
  0x11   :  { %50 = dma.hbm_to_smem %s48_s30, 16, %s994_s16, [#allocation10]  }
  0x12   :  { %s995_s19 = smov [#allocation12]   ;;  %s81_s20 = sshll.u32 %s1207_s5, 4  ;;  %s82_s20 = int_to_ptr.hbm [resolvable:$true] %s81_s20 }
  0x13   :  { %s57_s0 = sshll.u32 %s995_s19, 4  ;;  %s117_s23 = sshll.u32 %s1214_s12, 4  ;;  %s58_s0 = int_to_ptr.vmem [resolvable:$true] %s57_s0  ;;  %s118_s23 = int_to_ptr.hbm [resolvable:$true] %s117_s23 }
  0x14   :  { %63 = dma.hbm_to_vmem [thread:$0]  %s56_s15, 512, %s58_s0, [#allocation6], %s988_s17, %s988_s17, %s989_s18  }
  0x15   :  { %s996_s3 = smov [#allocation15]   ;;  %s997_s24 = smov [#allocation18]  }
  0x16   :  { %s83_s4 = sshll.u32 %s996_s3, 4  ;;  %s119_s27 = sshll.u32 %s997_s24, 4  ;;  %s84_s4 = int_to_ptr.vmem [resolvable:$true] %s83_s4  ;;  %s120_s27 = int_to_ptr.vmem [resolvable:$true] %s119_s27 }
  0x17   :  { %89 = dma.hbm_to_vmem [thread:$0]  %s82_s20, 2048, %s84_s4, [#allocation14], %s991_s25, %s991_s25, %s992_s26  }
  0x18   :  { %s998_s28 = smov 16   ;;  %s999_s5 = smov 1  }
  0x19   :  { %125 = dma.hbm_to_vmem [thread:$0]  %s118_s23, 32, %s120_s27, [#allocation17], %s998_s28, %s998_s28, %s999_s5  }
  0x1a   :  { %962 = dma.done.wait [#allocation8], 16  }
  0x1b   :  { %963 = vsyncadd [#allocation8], 4294967280 }
  0x1c   :  { %964 = dma.done.wait [#allocation10], 32  }
  0x1d   :  { %965 = vsyncadd [#allocation10], 4294967264 }
  0x1e   :  { %966 = dma.done.wait [#allocation6], 512  }
  0x1f   :  { %967 = vsyncadd [#allocation6], 4294966784 }
  0x20   :  { %968 = dma.done.wait [#allocation14], 4096  }
  0x21   :  { %969 = vsyncadd [#allocation14], 4294963200 }
  0x22   :  { %970 = dma.done.wait [#allocation17], 2080  }
  0x23   :  { %971 = vsyncadd [#allocation17], 4294965216 }
  0x24   :  { %158 = sfence }
  0x25   :  { %v159_v0 = vld [vmem:[#allocation12] sm:$0xff]  ;;  %v160_v1 = vld [vmem:[#allocation12 + $0x8] sm:$0xff]  ;;  %v161_v2 = vld [vmem:[#allocation12 + $0x10] sm:$0xff]  ;;  %s1103_s12 = smov 0  }
  0x26   :  { %163 = vst [vmem:[#allocation2] sm:$0xff] %v159_v0  ;;  %v162_v3 = vld [vmem:[#allocation12 + $0x18] sm:$0xff] }
  0x27   :  { %164 = vst [vmem:[#allocation2 + $0x8] sm:$0xff] %v160_v1 }
  0x28   :  { %165 = vst [vmem:[#allocation2 + $0x10] sm:$0xff] %v161_v2 }
  0x29   :  { %166 = vst [vmem:[#allocation2 + $0x18] sm:$0xff] %v162_v3 }
  0x2a LB: > { %s978_s25 = smov 0   ;;  %s976_s12 = sphi %s1103_s12, %s172_s12  }
  0x2b LB: >> { %s179_s26 = sld [smem:[#allocation5 + %s980_s25]]  ;;  %s182_s30 = scalar_lea.vmem [#allocation4], %s980_s25  ;;  %s980_s25 = sphi %s978_s25, %s178_s25  }
  0x2c   : >> { %s178_s25 = sadd.s32 1, %s980_s25  }
  0x2d   : >> { %p175_p0 = scmp.ge.s32.totalorder %s178_s25, 64  }
  0x2e   : > { %s1109_s9 = sshll.u32 (%p175_p0), %s976_s12, 6  ;;  %v1000_v11 = vmov (%p175_p0), 0.0   ;;  %s982_s15 = smov (%p175_p0), 0  }
  0x2f   : > { %177 = sbr.rel (!%p175_p0) target bundleno = 43 (0x2b), region = 138  ;;  %226 = vst [vmem:[#allocation3] sm:$0xff] (%p175_p0), %v1000_v11  ;;  %s193_s14 = scalar_lea.vmem (%p175_p0), [#allocation13], %s1109_s9 }
  0x30   : > { %v194_v12 = vld [vmem:[%s193_s14] sm:$0xff] (%p175_p0)  ;;  %v195_v13 = vld [vmem:[%s193_s14 + $0x8] sm:$0xff] (%p175_p0)  ;;  %v196_v14 = vld [vmem:[%s193_s14 + $0x10] sm:$0xff] (%p175_p0)  ;;  %227 = vst [vmem:[#allocation3 + $0x8] sm:$0xff] (%p175_p0), %v1000_v11 }
  0x31   : >> { %s180_s29 = scalar_lea.vmem [#allocation2], %s179_s26  ;;  %v197_v18 = vld [vmem:[%s193_s14 + $0x18] sm:$0xff] (%p175_p0)  ;;  %v198_v19 = vld [vmem:[%s193_s14 + $0x20] sm:$0xff] (%p175_p0)  ;;  %v199_v20 = vld [vmem:[%s193_s14 + $0x28] sm:$0xff] (%p175_p0)  ;;  %228 = vst [vmem:[#allocation3 + $0x10] sm:$0xff] (%p175_p0), %v1000_v11 }
  0x32   : >> { %v181_v4 = vld [vmem:[%s180_s29] sm:$0x1]  ;;  %v200_v25 = vld [vmem:[%s193_s14 + $0x30] sm:$0xff] (%p175_p0)  ;;  %229 = vst [vmem:[#allocation3 + $0x18] sm:$0xff] (%p175_p0), %v1000_v11  ;;  %v201_v31 = vld [vmem:[%s193_s14 + $0x38] sm:$0xff] (%p175_p0) }
  0x33   : >> { %183 = vst [vmem:[%s182_s30] sm:$0x1] %v181_v4 }
  0x3a   : > { %v184_v5 = vld [vmem:[#allocation4] sm:$0xff]  ;;  %v185_v6 = vld [vmem:[#allocation4 + $0x8] sm:$0xff]  ;;  %v186_v7 = vld [vmem:[#allocation4 + $0x10] sm:$0xff] }
  0x3b   : > { %v187_v8 = vld [vmem:[#allocation4 + $0x18] sm:$0xff]  ;;  %v188_v9 = vld [vmem:[#allocation4 + $0x20] sm:$0xff]  ;;  %v189_v10 = vld [vmem:[#allocation4 + $0x28] sm:$0xff]  ;;  %v202_v15 = vadd.f32 %v194_v12, %v184_v5  ;;  %v203_v16 = vadd.f32 %v195_v13, %v185_v6  ;;  %v204_v17 = vadd.f32 %v196_v14, %v186_v7 }
  0x3c   : > { %v205_v21 = vadd.f32 %v197_v18, %v187_v8  ;;  %v206_v22 = vadd.f32 %v198_v19, %v188_v9  ;;  %v207_v23 = vadd.f32 %v199_v20, %v189_v10  ;;  %v190_v24 = vld [vmem:[#allocation4 + $0x30] sm:$0xff]  ;;  %v191_v26 = vld [vmem:[#allocation4 + $0x38] sm:$0xff] }
  0x3d   : > { %v210_v27 = vmax.f32 %v202_v15, 0.0  ;;  %v211_v28 = vmax.f32 %v203_v16, 0.0  ;;  %v212_v29 = vmax.f32 %v204_v17, 0.0  ;;  %v208_v30 = vadd.f32 %v200_v25, %v190_v24 }
  0x3e   : > { %v213_v32 = vmax.f32 %v205_v21, 0.0  ;;  %v209_v33 = vadd.f32 %v201_v31, %v191_v26  ;;  %v214_v34 = vmax.f32 %v206_v22, 0.0  ;;  %v215_v35 = vmax.f32 %v207_v23, 0.0 }
  0x3f   : > { %218 = vst [vmem:[#allocation4] sm:$0xff] %v210_v27  ;;  %v216_v36 = vmax.f32 %v208_v30, 0.0 }
  0x40   : > { %219 = vst [vmem:[#allocation4 + $0x8] sm:$0xff] %v211_v28  ;;  %v217_v37 = vmax.f32 %v209_v33, 0.0 }
  0x41   : > { %220 = vst [vmem:[#allocation4 + $0x10] sm:$0xff] %v212_v29 }
  0x42   : > { %221 = vst [vmem:[#allocation4 + $0x18] sm:$0xff] %v213_v32 }
  0x43   : > { %222 = vst [vmem:[#allocation4 + $0x20] sm:$0xff] %v214_v34 }
  0x44   : > { %223 = vst [vmem:[#allocation4 + $0x28] sm:$0xff] %v215_v35 }
  0x45   : > { %224 = vst [vmem:[#allocation4 + $0x30] sm:$0xff] %v216_v36 }
  0x46   : > { %225 = vst [vmem:[#allocation4 + $0x38] sm:$0xff] %v217_v37 }
  0x47 LB: >> { %s236_s16 = sld [smem:[#allocation9 + %s984_s15]]  ;;  %s239_s19 = scalar_lea.vmem [#allocation4], %s984_s15  ;;  %s984_s15 = sphi %s982_s15, %s235_s15  }
  0x48   : >> { %s235_s15 = sadd.s32 1, %s984_s15  }
  0x49   : >> { %p232_p1 = scmp.ge.s32.totalorder %s235_s15, 64  }
  0x4a   : > { %s1113_s1 = scalar_lea.vmem (%p232_p1), [#allocation15], %s1109_s9  ;;  %s282_s2 = scalar_lea.vmem (%p232_p1), %s1208_s6, %s976_s12  ;;  %v1125_v46 = vld [vmem:[#allocation2] sm:$0xff] (%p232_p1)  ;;  %v1127_v47 = vld [vmem:[#allocation2 + $0x8] sm:$0xff] (%p232_p1)  ;;  %v1130_v50 = vld [vmem:[#allocation2 + $0x10] sm:$0xff] (%p232_p1)  ;;  %v1001_v5 = vmov (%p232_p1), 32.0  }
  0x4b   : > { %v693_v41 = vld [vmem:[%s1113_s1 + $0x38] sm:$0xff] (%p232_p1)  ;;  %v692_v42 = vld [vmem:[%s1113_s1 + $0x30] sm:$0xff] (%p232_p1)  ;;  %v691_v43 = vld [vmem:[%s1113_s1 + $0x28] sm:$0xff] (%p232_p1)  ;;  %s251_s22 = sld [smem:[#allocation11 + %s976_s12]] (%p232_p1)  ;;  %s404_s4 = scalar_lea.vmem (%p232_p1), %s1209_s7, %s976_s12  ;;  %766 = vrcp.f32 (%p232_p1), %v1001_v5 }
  0x4c   : > { %335 = vmatpush.bf16.msra.mxu0 (%p232_p1), %v693_v41  ;;  %703 = vmatpush.bf16.msra.mxu2 (%p232_p1), %v693_v41  ;;  %v690_v44 = vld [vmem:[%s1113_s1 + $0x20] sm:$0xff] (%p232_p1)  ;;  %v689_v45 = vld [vmem:[%s1113_s1 + $0x18] sm:$0xff] (%p232_p1)  ;;  %v688_v48 = vld [vmem:[%s1113_s1 + $0x10] sm:$0xff] (%p232_p1)  ;;  %s413_s28 = scalar_lea.vmem (%p232_p1), %s1210_s8, %s976_s12  ;;  %s446_s26 = scalar_lea.vmem (%p232_p1), %s1212_s10, %s976_s12 }
  0x4d   : >> { %v240_v38 = vld [vmem:[%s239_s19] sm:$0x1]  ;;  %s237_s0 = scalar_lea.vmem [#allocation3], %s236_s16  ;;  %234 = sbr.rel (!%p232_p1) target bundleno = 71 (0x47), region = 149  ;;  %v1132_v51 = vld [vmem:[#allocation2 + $0x18] sm:$0xff] (%p232_p1)  ;;  %v687_v52 = vld [vmem:[%s1113_s1 + $0x8] sm:$0xff] (%p232_p1) }
  0x4e   : >> { %v238_v39 = vld [vmem:[%s237_s0] sm:$0x1]  ;;  %s1158_s14 = scalar_lea.vmem (%p232_p1), [#allocation16], %s1109_s9  ;;  %s522_s21 = scalar_lea.vmem (%p232_p1), %s1213_s11, %s976_s12 }
  0x4f   : >> { %v241_v40 = vadd.f32 %v240_v38, %v238_v39  ;;  %v686_v1 = vld [vmem:[%s1113_s1] sm:$0xff] (%p232_p1)  ;;  %v702_v23 = vld [vmem:[%s1158_s14 + $0x38] sm:$0xff] (%p232_p1)  ;;  %v701_v27 = vld [vmem:[%s1158_s14 + $0x30] sm:$0xff] (%p232_p1)  ;;  %s531_s20 = scalar_lea.vmem (%p232_p1), [#allocation18], %s976_s12  ;;  %p540_p2 = scmp.lt.s32.totalorder (%p232_p1), %s976_s12, 1 }
  0x50   : > { %336 = vmatpush.bf16.msra.mxu0 (%p232_p1), %v692_v42  ;;  %704 = vmatpush.bf16.msra.mxu2 (%p232_p1), %v692_v42  ;;  %v760_v6 = vld [vmem:[%s282_s2] ss:$0 sm:$0xff] (%p232_p1)  ;;  %v700_v31 = vld [vmem:[%s1158_s14 + $0x28] sm:$0xff] (%p232_p1)  ;;  %v698_v42 = vld [vmem:[%s1158_s14 + $0x18] sm:$0xff] (%p232_p1)  ;;  %s172_s12 = sadd.s32 (%p232_p1), 1, %s976_s12  }
  0x51   : >> { %242 = vst [vmem:[%s237_s0] sm:$0x1] %v241_v40  ;;  %v252_v49 = vstv (%p232_p1), %s251_s22  ;;  %v767_v9 = vpop.eup (%p232_p1), %766  ;;  %499 = vmatpush.bf16.msra.mxu1 (%p232_p1), %v702_v23  ;;  %711 = vmatpush.bf16.msra.mxu3 (%p232_p1), %v702_v23  ;;  %v699_v36 = vld [vmem:[%s1158_s14 + $0x20] sm:$0xff] (%p232_p1)  ;;  %p169_p3 = scmp.ge.s32.totalorder (%p232_p1), %s172_s12, 2  }
  0x52   : > { %v253_v54 = vmul.f32 %v252_v49, %v1125_v46  ;;  %v254_v55 = vmul.f32 %v252_v49, %v1127_v47  ;;  %v255_v56 = vmul.f32 %v252_v49, %v1130_v50  ;;  %v256_v57 = vmul.f32 %v252_v49, %v1132_v51  ;;  %s541_s23 = scalar_select %p540_p2, 0.0, -inf }
  0x53   : > { %v364_v13 = vmul.f32 32.0, %v767_v9  ;;  %vm368_vm0 = vweird.f32 %v767_v9  ;;  %s569_s24 = sshll.u32 (%p169_p3), %s1215_s13, 4  ;;  %s1002_s27 = smov (%p169_p3), [#allocation19]   ;;  %s570_s24 = int_to_ptr.hbm [resolvable:$true] %s569_s24 }
  0x54   : > { %337 = vmatpush.bf16.msra.mxu0 %v691_v43  ;;  %705 = vmatpush.bf16.msra.mxu2 %v691_v43 }
  0x55   : > { %v365_v18 = vsub.f32 1.0, %v364_v13  ;;  %500 = vmatpush.bf16.msra.mxu1 %v701_v27  ;;  %712 = vmatpush.bf16.msra.mxu3 %v701_v27  ;;  %v764_v27 = vld [vmem:[%s522_s21] ss:$0 sm:$0xff] }
  0x57   : > { %v366_v21 = vmul.f32 %v767_v9, %v365_v18 }
  0x58   : > { %338 = vmatpush.bf16.msra.mxu0 %v690_v44  ;;  %706 = vmatpush.bf16.msra.mxu2 %v690_v44  ;;  %v247_v53 = vld [vmem:[#allocation3] sm:$0xff]  ;;  %v248_v58 = vld [vmem:[#allocation3 + $0x8] sm:$0xff]  ;;  %v249_v59 = vld [vmem:[#allocation3 + $0x10] sm:$0xff] }
  0x59   : > { %v250_v60 = vld [vmem:[#allocation3 + $0x18] sm:$0xff]  ;;  %v257_v61 = vadd.f32 %v253_v54, %v247_v53  ;;  %v258_v62 = vadd.f32 %v254_v55, %v248_v58  ;;  %v259_v63 = vadd.f32 %v255_v56, %v249_v59  ;;  %v367_v25 = vadd.f32 %v767_v9, %v366_v21  ;;  %501 = vmatpush.bf16.msra.mxu1 %v700_v31  ;;  %v696_v53 = vld [vmem:[%s1158_s14 + $0x8] sm:$0xff]  ;;  %v695_v55 = vld [vmem:[%s1158_s14] sm:$0xff] }
  0x5a   : > { %v260_v0 = vadd.f32 %v256_v57, %v250_v60  ;;  %713 = vmatpush.bf16.msra.mxu3 %v700_v31  ;;  %v542_v31 = vstv %s541_s23 }
  0x5b   : > { %v261_v2 = vpack.c.bf16 %v258_v62, %v257_v61  ;;  %v369_v29 = vsel %vm368_vm0, %v767_v9, %v367_v25 }
  0x5c   : > { %339 = vmatpush.bf16.msra.mxu0 %v689_v45  ;;  %707 = vmatpush.bf16.msra.mxu2 %v689_v45  ;;  %v262_v3 = vpack.c.bf16 %v260_v0, %v259_v63 }
  0x5d   : > { %502 = vmatpush.bf16.msra.mxu1 %v699_v36 }
  0x5e   : > { %714 = vmatpush.bf16.msra.mxu3 %v699_v36 }
  0x60   : > { %340 = vmatpush.bf16.msra.mxu0 %v688_v48  ;;  %708 = vmatpush.bf16.msra.mxu2 %v688_v48  ;;  %v697_v48 = vld [vmem:[%s1158_s14 + $0x10] sm:$0xff] }
  0x61   : > { %503 = vmatpush.bf16.msra.mxu1 %v698_v42 }
  0x62   : > { %715 = vmatpush.bf16.msra.mxu3 %v698_v42 }
  0x64   : > { %341 = vmatpush.bf16.msra.mxu0 %v687_v52  ;;  %709 = vmatpush.bf16.msra.mxu2 %v687_v52 }
  0x65   : > { %504 = vmatpush.bf16.msra.mxu1 %v697_v48 }
  0x66   : > { %716 = vmatpush.bf16.msra.mxu3 %v697_v48 }
  0x68   : > { %342 = vmatpush.bf16.msra.mxu0 %v686_v1  ;;  %710 = vmatpush.bf16.msra.mxu2 %v686_v1 }
  0x69   : > { %505 = vmatpush.bf16.msra.mxu1 %v696_v53 }
  0x6a   : > { %717 = vmatpush.bf16.msra.mxu3 %v696_v53 }
  0x6b   : > { %343 = vmatmul.bf16.vlgmr.msra.gmra.mxu0 %v261_v2  ;;  %348 = vmatmul.bf16.vlgmr.msra.gmra.mxu2 %v262_v3  ;;  %v761_v3 = vld [vmem:[%s404_s4] ss:$0 sm:$0xff] }
  0x6d   : > { %506 = vmatpush.bf16.msra.mxu1 %v695_v55 }
  0x6e   : > { %718 = vmatpush.bf16.msra.mxu3 %v695_v55 }
  0xe8   : > { %v344_v4 = vpop.f32.mrf.mxu0 }
  0xe9   : > { %v345_v10 = vadd.f32 %v760_v6, %v344_v4 }
  0xee   : > { %v349_v7 = vpop.f32.mrf.mxu2 }
  0xef   : > { %v350_v14 = vadd.f32 %v760_v6, %v349_v7 }
  0xf0   : > { %v346_v8 = vpop.f32.mrf.mxu0 }
  0xf1   : > { %v347_v11 = vadd.f32 %v760_v6, %v346_v8  ;;  %v762_v8 = vld [vmem:[%s413_s28] ss:$0 sm:$0xff]  ;;  %s567_s28 = sshll.u32 (%p169_p3), %s1002_s27, 4  ;;  %s568_s28 = int_to_ptr.vmem [resolvable:$true] %s567_s28 }
  0xf3   : > { %v354_v12 = vadd.f32 %v347_v11, %v345_v10 }
  0xf5   : > { %v355_v17 = vadd.f32 %v354_v12, %v350_v14 }
  0xf6   : > { %v351_v15 = vpop.f32.mrf.mxu2 }
  0xf7   : > { %v352_v16 = vadd.f32 %v760_v6, %v351_v15 }
  0xf9   : > { %v356_v19 = vadd.f32 %v355_v17, %v352_v16 }
  0xfb   : > { %v357_v20 = vrot.slane %v356_v19, 4 }
  0xfd   : > { %v358_v22 = vadd.f32 %v357_v20, %v356_v19 }
  0xff   : > { %v359_v24 = vrot.slane %v358_v22, 2 }
 0x101   : > { %v360_v26 = vadd.f32 %v359_v24, %v358_v22  ;;  %v763_v24 = vld [vmem:[%s446_s26] ss:$0 sm:$0xff] }
 0x103   : > { %v361_v28 = vrot.slane %v360_v26, 1 }
 0x105   : > { %v362_v30 = vadd.f32 %v361_v28, %v360_v26 }
 0x107   : > { %v370_v32 = vmul.f32 %v369_v29, %v362_v30 }
 0x109   : > { %v371_v33 = vsub.f32 %v345_v10, %v370_v32  ;;  %v372_v34 = vsub.f32 %v347_v11, %v370_v32  ;;  %v373_v35 = vsub.f32 %v350_v14, %v370_v32  ;;  %v374_v37 = vsub.f32 %v352_v16, %v370_v32 }
 0x10b   : > { %v375_v38 = vmul.f32 %v371_v33, %v371_v33  ;;  %v376_v39 = vmul.f32 %v372_v34, %v372_v34  ;;  %v377_v40 = vmul.f32 %v373_v35, %v373_v35  ;;  %v378_v43 = vmul.f32 %v374_v37, %v374_v37 }
 0x10d   : > { %v379_v41 = vadd.f32 %v376_v39, %v375_v38 }
 0x10f   : > { %v380_v44 = vadd.f32 %v379_v41, %v377_v40 }
 0x111   : > { %v381_v45 = vadd.f32 %v380_v44, %v378_v43 }
 0x113   : > { %v382_v49 = vrot.slane %v381_v45, 4 }
 0x115   : > { %v383_v52 = vadd.f32 %v382_v49, %v381_v45 }
 0x117   : > { %v384_v54 = vrot.slane %v383_v52, 2 }
 0x119   : > { %v385_v56 = vadd.f32 %v384_v54, %v383_v52 }
 0x11b   : > { %v386_v57 = vrot.slane %v385_v56, 1 }
 0x11d   : > { %v387_v58 = vadd.f32 %v386_v57, %v385_v56 }
 0x11f   : > { %v388_v59 = vmul.f32 %v387_v58, %v369_v29  ;;  %v765_v29 = vld [vmem:[%s531_s20] ss:$0 sm:$0xff] }
 0x121   : > { %v389_v60 = vadd.f32 1e-05, %v388_v59 }
 0x123   : > { %768 = vrsqrt.f32 %v389_v60  ;;  %vm396_vm2 = vweird.f32 %v389_v60 }
 0x129   : > { %v769_v61 = vpop.eup %768 }
 0x12a   : > { %v391_v62 = vmul.f32 %v769_v61, %v389_v60  ;;  %vm397_vm1 = vweird.f32 %v769_v61 }
 0x12b   : > { %vm398_vm3 = vmor %vm396_vm2, %vm397_vm1 }
 0x12c   : > { %v392_v63 = vmul.f32 %v769_v61, %v391_v62 }
 0x12e   : > { %v393_v0 = vmul.f32 0.5, %v392_v63 }
 0x130   : > { %v394_v1 = vsub.f32 1.5, %v393_v0 }
 0x132   : > { %v395_v2 = vmul.f32 %v769_v61, %v394_v1 }
 0x134   : > { %v399_v4 = vsel %vm398_vm3, %v769_v61, %v395_v2 }
 0x135   : > { %v403_v5 = vmul.f32 %v399_v4, %v374_v37  ;;  %v400_v6 = vmul.f32 %v399_v4, %v371_v33  ;;  %v401_v7 = vmul.f32 %v399_v4, %v372_v34  ;;  %v402_v9 = vmul.f32 %v399_v4, %v373_v35 }
 0x137   : > { %v409_v10 = vmul.f32 %v761_v3, %v400_v6  ;;  %v410_v11 = vmul.f32 %v761_v3, %v401_v7  ;;  %v411_v12 = vmul.f32 %v761_v3, %v402_v9  ;;  %v412_v13 = vmul.f32 %v761_v3, %v403_v5 }
 0x139   : > { %v418_v14 = vadd.f32 %v762_v8, %v409_v10  ;;  %v419_v15 = vadd.f32 %v762_v8, %v410_v11  ;;  %v420_v16 = vadd.f32 %v762_v8, %v411_v12  ;;  %v421_v17 = vadd.f32 %v762_v8, %v412_v13 }
 0x13b   : > { %v422_v18 = vmax.f32 %v418_v14, 0.0  ;;  %v423_v19 = vmax.f32 %v419_v15, 0.0  ;;  %v424_v20 = vmax.f32 %v420_v16, 0.0  ;;  %v425_v21 = vmax.f32 %v421_v17, 0.0 }
 0x13d   : > { %v426_v22 = vpack.c.bf16 %v423_v19, %v422_v18  ;;  %v427_v23 = vpack.c.bf16 %v425_v21, %v424_v20 }
 0x13f   : > { %507 = vmatmul.bf16.vlgmr.msra.gmra.mxu1 %v426_v22  ;;  %512 = vmatmul.bf16.vlgmr.msra.gmra.mxu3 %v427_v23 }
 0x1bc   : > { %v508_v25 = vpop.f32.mrf.mxu1 }
 0x1bd   : > { %v509_v26 = vadd.f32 %v763_v24, %v508_v25 }
 0x1bf   : > { %v518_v28 = vmax.f32 %v509_v26, 0.0 }
 0x1c1   : > { %v527_v30 = vmul.f32 %v764_v27, %v518_v28 }
 0x1c2   : > { %v513_v32 = vpop.f32.mrf.mxu3 }
 0x1c3   : > { %v536_v33 = vadd.f32 %v765_v29, %v527_v30  ;;  %v514_v34 = vadd.f32 %v763_v24, %v513_v32 }
 0x1c4   : > { %v510_v35 = vpop.f32.mrf.mxu1 }
 0x1c5   : > { %v543_v36 = vmax.f32 %v536_v33, %v542_v31  ;;  %v520_v37 = vmax.f32 %v514_v34, 0.0  ;;  %v511_v38 = vadd.f32 %v763_v24, %v510_v35 }
 0x1c7   : > { %v547_v39 = vadd.f32 %v543_v36, %v1125_v46  ;;  %v529_v40 = vmul.f32 %v764_v27, %v520_v37  ;;  %v519_v41 = vmax.f32 %v511_v38, 0.0 }
 0x1c9   : > { %551 = vst [vmem:[#allocation2] sm:$0xff] %v547_v39  ;;  %v538_v42 = vadd.f32 %v765_v29, %v529_v40  ;;  %v528_v43 = vmul.f32 %v764_v27, %v519_v41 }
 0x1ca   : > { %v515_v44 = vpop.f32.mrf.mxu3 }
 0x1cb   : > { %v545_v45 = vmax.f32 %v538_v42, %v542_v31  ;;  %v537_v48 = vadd.f32 %v765_v29, %v528_v43  ;;  %v516_v49 = vadd.f32 %v763_v24, %v515_v44 }
 0x1cd   : > { %v549_v52 = vadd.f32 %v545_v45, %v1130_v50  ;;  %v544_v53 = vmax.f32 %v537_v48, %v542_v31  ;;  %v521_v54 = vmax.f32 %v516_v49, 0.0 }
 0x1cf   : > { %553 = vst [vmem:[#allocation2 + $0x10] sm:$0xff] %v549_v52  ;;  %v548_v55 = vadd.f32 %v544_v53, %v1127_v47  ;;  %v530_v56 = vmul.f32 %v764_v27, %v521_v54 }
 0x1d0   :  { %v555_v59 = vld [vmem:[#allocation2] sm:$0xff] (%p169_p3) }
 0x1d1   : > { %552 = vst [vmem:[#allocation2 + $0x8] sm:$0xff] %v548_v55  ;;  %v539_v57 = vadd.f32 %v765_v29, %v530_v56 }
 0x1d2   :  { %559 = vst [vmem:[#allocation19] sm:$0xff] (%p169_p3), %v555_v59 }
 0x1d3   : > { %v546_v46 = vmax.f32 %v539_v57, %v542_v31  ;;  %171 = sbr.rel (!%p169_p3) target bundleno = 42 (0x2a), region = 160 }
 0x1d5   : > { %v550_v58 = vadd.f32 %v546_v46, %v1132_v51 }
 0x1d6   :  { %v557_v60 = vld [vmem:[#allocation2 + $0x10] sm:$0xff] (%p169_p3) }
 0x1d7   : > { %554 = vst [vmem:[#allocation2 + $0x18] sm:$0xff] %v550_v58 }
 0x1d8   :  { %v556_v50 = vld [vmem:[#allocation2 + $0x8] sm:$0xff]  ;;  %561 = vst [vmem:[#allocation19 + $0x10] sm:$0xff] %v557_v60 }
 0x1d9   :  { %560 = vst [vmem:[#allocation19 + $0x8] sm:$0xff] %v556_v50 }
 0x1de   :  { %v558_v47 = vld [vmem:[#allocation2 + $0x18] sm:$0xff] }
 0x1df   :  { %562 = vst [vmem:[#allocation19 + $0x18] sm:$0xff] %v558_v47 }
 0x1e0   :  { %575 = dma.vmem_to_hbm [thread:$0]  %s568_s28, 512, %s570_s24, [#allocation7], %s988_s17, %s988_s17, %s989_s18  }
 0x1e1   :  { %972 = dma.done.wait [#allocation7], 512  }
 0x1e2   :  { %973 = vsyncadd [#allocation7], 4294966784 }
 0x1e3   :  { %580 = vsyncpa [#allocation6], 1 }
 0x1e4   :  { %581 = vsyncpa [#allocation14], 1 }
 0x1e5   :  { %582 = vsyncpa [#allocation17], 1 }
 0x1e6   :  { %583 = vsyncpa [#allocation7], 1 }
 0x1e7   :  { %584 = vsyncpa [#allocation8], 1 }
 0x1e8   :  { %585 = vsyncpa [#allocation10], 1 }

</bundles_post_ra>
